<compile_context>
chip_gen: v7x
topology: tpu7x:2x2x1
jax: 0.10.0
libtpu: 0.0.40
codegen_flags: <defaults>
</compile_context>

<pallas_src>
import jax
import jax.numpy as jnp
from jax.experimental import pallas as pl
from jax.experimental.pallas import tpu as pltpu


# ---------------------------------------------------------------------------
# Kernels: elementwise affine on a (TR, TL) tile; scale/shift is a (TR, 1)
# column broadcast along the lane axis by the VPU.
# ---------------------------------------------------------------------------
def _affine_kernel(gamma_ref, beta_ref, x_ref, o_ref):
    # (1 + gamma) * x + beta
    o_ref[...] = ((1.0 + gamma_ref[...]) * x_ref[...]
                  + beta_ref[...]).astype(o_ref.dtype)


def _shift_kernel(shift_ref, x_ref, o_ref):
    # x + shift
    o_ref[...] = (x_ref[...] + shift_ref[...]).astype(o_ref.dtype)


# ---------------------------------------------------------------------------
# Tiling helper: largest tile <= cap that divides `total` and is a multiple of
# `align`; falls back to the full extent (always a legal BlockSpec).
# ---------------------------------------------------------------------------
def _pick_tile(total, align, cap):
    if total <= cap:
        return total
    if total % align != 0:
        return total            # full extent: legal even if unaligned
    best = align
    t = align
    while t <= cap:
        if total % t == 0:
            best = t
        t += align
    return best


# ---------------------------------------------------------------------------
# Wrapper: FeatureWiseAffine.forward
# ---------------------------------------------------------------------------
def feature_wise_affine(x, noise_embed, weight, bias, use_affine_level=False):
    """Pallas implementation of FeatureWiseAffine.forward.

    x:           (B, C, H, W)
    noise_embed: (B, in_channels)
    weight:      (in_channels, C * (1 + use_affine_level))  (W^T of nn.Linear)
    bias:        (C * (1 + use_affine_level),)
    """
    B, C, H, W = x.shape
    in_ch = noise_embed.shape[1]
    out_dim = C * (2 if use_affine_level else 1)
    assert weight.shape == (in_ch, out_dim)
    assert bias.shape == (out_dim,)

    # Hoisted Linear: a (B, in_ch) @ (in_ch, out_dim) matmul is negligible in
    # the wrapper, but in-kernel it was a serial per-step MXU + relayout prologue.
    proj = jnp.dot(noise_embed, weight,
                   preferred_element_type=jnp.float32) + bias.astype(jnp.float32)

    R = B * C          # rows  (sublane axis)
    L = H * W          # lanes (fast axis)
    x2 = x.reshape(R, L)

    # Row tiles multiple of 8, lane tiles multiple of 128, block <= ~2 MiB
    # (256 x 2048 f32) so double-buffered in+out fits VMEM on every TPU gen.
    TR = _pick_tile(R, 8, 256)
    TL = _pick_tile(L, 128, 2048)
    grid = (pl.cdiv(R, TR), pl.cdiv(L, TL))

    row_spec = pl.BlockSpec((TR, 1), lambda r, l: (r, 0))    # gamma/beta/shift
    x_spec = pl.BlockSpec((TR, TL), lambda r, l: (r, l))     # x / out tile

    itemsize = jnp.dtype(x.dtype).itemsize
    n_cols = 2 if use_affine_level else 1
    cost = pl.CostEstimate(
        flops=(3 if use_affine_level else 1) * R * L,
        transcendentals=0,
        bytes_accessed=2 * R * L * itemsize + R * n_cols * 4,
    )
    cparams = pltpu.CompilerParams(
        dimension_semantics=("parallel", "parallel"),
        vmem_limit_bytes=32 * 1024 * 1024,
    )

    if use_affine_level:
        gamma = proj[:, :C].reshape(R, 1)
        beta = proj[:, C:].reshape(R, 1)
        out = pl.pallas_call(
            _affine_kernel,
            out_shape=jax.ShapeDtypeStruct((R, L), x.dtype),
            grid_spec=pltpu.PrefetchScalarGridSpec(
                num_scalar_prefetch=0,
                grid=grid,
                in_specs=[row_spec, row_spec, x_spec],
                out_specs=x_spec,
            ),
            compiler_params=cparams,
            cost_estimate=cost,
        )(gamma, beta, x2)
    else:
        shift = proj.reshape(R, 1)
        out = pl.pallas_call(
            _shift_kernel,
            out_shape=jax.ShapeDtypeStruct((R, L), x.dtype),
            grid_spec=pltpu.PrefetchScalarGridSpec(
                num_scalar_prefetch=0,
                grid=grid,
                in_specs=[row_spec, x_spec],
                out_specs=x_spec,
            ),
            compiler_params=cparams,
            cost_estimate=cost,
        )(shift, x2)

    return out.reshape(B, C, H, W)


# ---------------------------------------------------------------------------
# Pure-JAX reference mirroring the PyTorch forward.
# ---------------------------------------------------------------------------
def feature_wise_affine_ref(x, noise_embed, weight, bias, use_affine_level=False):
    B, C = x.shape[0], x.shape[1]
    proj = noise_embed @ weight + bias                 # (B, out_dim)
    proj = proj.reshape(B, -1, 1, 1)
    if use_affine_level:
        gamma, beta = proj[:, :C], proj[:, C:]
        return (1.0 + gamma) * x + beta
    return x + proj


if __name__ == "__main__":
    key = jax.random.PRNGKey(0)
    k_x, k_ne, k_w1, k_b1, k_w2, k_b2 = jax.random.split(key, 6)

    B, C, H, W = 2, 4, 16, 16       # out_channels = C
    in_channels = 32

    x = jax.random.normal(k_x, (B, C, H, W), dtype=jnp.float32)
    noise_embed = jax.random.normal(k_ne, (B, in_channels), dtype=jnp.float32)

    # --- mode 1: use_affine_level = False (out_dim = C) ---
    w_plain = jax.random.normal(k_w1, (in_channels, C), dtype=jnp.float32) * 0.1
    b_plain = jax.random.normal(k_b1, (C,), dtype=jnp.float32) * 0.1
    out_plain = feature_wise_affine(x, noise_embed, w_plain, b_plain,
                                    use_affine_level=False)
    jax.block_until_ready(out_plain)
    ref_plain = feature_wise_affine_ref(x, noise_embed, w_plain, b_plain,
                                        use_affine_level=False)
    assert jnp.allclose(out_plain, ref_plain, atol=1e-5, rtol=1e-5), "plain mode mismatch"

    # --- mode 2: use_affine_level = True (out_dim = 2*C) ---
    w_aff = jax.random.normal(k_w2, (in_channels, 2 * C), dtype=jnp.float32) * 0.1
    b_aff = jax.random.normal(k_b2, (2 * C,), dtype=jnp.float32) * 0.1
    out_aff = feature_wise_affine(x, noise_embed, w_aff, b_aff,
                                  use_affine_level=True)
    jax.block_until_ready(out_aff)
    ref_aff = feature_wise_affine_ref(x, noise_embed, w_aff, b_aff,
                                      use_affine_level=True)
    assert jnp.allclose(out_aff, ref_aff, atol=1e-5, rtol=1e-5), "affine mode mismatch"

    print("KERNEL_OK")
</pallas_src>

<mosaic_0001>
module attributes {stable_mosaic.version = 11 : i64} {
  func.func @_shift_kernel(%arg0: i32, %arg1: i32, %arg2: memref<8x1xf32, #tpu.memory_space<vmem>>, %arg3: memref<8x256xf32, #tpu.memory_space<vmem>>, %arg4: memref<8x256xf32, #tpu.memory_space<vmem>>) attributes {dimension_semantics = [#tpu.dimension_semantics<parallel>, #tpu.dimension_semantics<parallel>], iteration_bounds = array<i64: 1, 1>, scalar_prefetch = 0 : i64, scratch_operands = 0 : i64, tpu.core_type = #tpu.core_type<tc>, window_params = [{transform_indices = @transform_0, window_bounds = array<i64: 8, 1>}, {transform_indices = @transform_1, window_bounds = array<i64: 8, 256>}, {transform_indices = @transform_2, window_bounds = array<i64: 8, 256>}]} {
    %c0 = arith.constant 0 : index
    %c0_0 = arith.constant 0 : index
    %0 = vector.load %arg3[%c0, %c0_0] : memref<8x256xf32, #tpu.memory_space<vmem>>, vector<8x256xf32>
    %c0_1 = arith.constant 0 : index
    %c0_2 = arith.constant 0 : index
    %1 = vector.load %arg2[%c0_1, %c0_2] : memref<8x1xf32, #tpu.memory_space<vmem>>, vector<8x1xf32>
    %2 = vector.broadcast %1 : vector<8x1xf32> to vector<8x256xf32>
    %3 = arith.addf %0, %2 : vector<8x256xf32>
    %c0_3 = arith.constant 0 : index
    %c0_4 = arith.constant 0 : index
    %4 = vector.load %arg4[%c0_3, %c0_4] : memref<8x256xf32, #tpu.memory_space<vmem>>, vector<8x256xf32>
    tpu.vector_store %arg4[%c0_3, %c0_4], %3 {strides = array<i32>} : memref<8x256xf32, #tpu.memory_space<vmem>>, vector<8x256xf32>,
    return
  }
  func.func @transform_0(%arg0: i32, %arg1: i32) -> (i32, i32) {
    %c0_i32 = arith.constant 0 : i32
    %c0_i32_0 = arith.constant 0 : i32
    return %arg0, %c0_i32 : i32, i32
  }
  func.func @transform_1(%arg0: i32, %arg1: i32) -> (i32, i32) {
    %c0_i32 = arith.constant 0 : i32
    return %arg0, %arg1 : i32, i32
  }
  func.func @transform_2(%arg0: i32, %arg1: i32) -> (i32, i32) {
    %c0_i32 = arith.constant 0 : i32
    return %arg0, %arg1 : i32, i32
  }
}

</mosaic_0001>

<bundles_post_ra>
// kernel: tpu_custom_call.1
= control target key start
LH: loop header
LB: loop body
LE: loop exit
PB: predicated region body
PF: predicated region fallthrough
CT: control target
= control target key end

     0   :  { %7 = vsyncpa [#allocation3], 0  ;;  %s148_s0 = inlined_call_operand.vmem [shape: f32[8,1], index: 0, kind: input, shape index: {}]   ;;  %s149_s1 = inlined_call_operand.hbm [shape: f32[8,256], index: 1, kind: input, shape index: {}]   ;;  %s150_s2 = inlined_call_operand.hbm [shape: f32[8,256], index: 2, kind: output, shape index: {}]  }
   0x1   :  { %8 = vsyncpa [#allocation4], 0  ;;  %s103_s9 = smov [#allocation2]   ;;  %s55_s13 = scalar_lea.hbm %s149_s1, 256 }
   0x2   :  { %s17_s10 = sshll.u32 %s103_s9, 4  ;;  %p56_p0 = scmp.ne.s32.totalorder %s149_s1, %s55_s13  ;;  %s18_s10 = int_to_ptr.vmem [resolvable:$true] %s17_s10 }
   0x3   :  { %p59_p1 = scmp.lt.u32.totalorder %s55_s13, %s149_s1 }
   0x5   :  { %p61_p2 = pnand %p59_p1, %p56_p0 }
   0x7   :  { %64 = shalt.err (!%p61_p2)
}
   0x8   :  { %s65_s18 = scalar_lea.vmem %s18_s10, 256  ;;  %p70_p4 = scmp.lt.s32.totalorder %s18_s10, %s18_s10 }
   0x9   :  { %p66_p3 = scmp.ne.s32.totalorder %s18_s10, %s65_s18  ;;  %p71_p5 = scmp.lt.s32.totalorder %s65_s18, %s65_s18 }
   0xb   :  { %p72_p6 = por %p71_p5, %p70_p4 }
   0xd   :  { %p73_p7 = pnand %p72_p6, %p66_p3 }
   0xf   :  { %76 = shalt.err (!%p73_p7)
}
  0x10   :  { %20 = dma.hbm_to_vmem [thread:$0]  %s149_s1, 256, %s18_s10, [#allocation3]  }
  0x11   :  { %99 = dma.done.wait [#allocation3], 256  }
  0x12   :  { %100 = vsyncadd [#allocation3], 4294967040  ;;  %v104_v0 = vmov 0   ;;  %v26_v1 = vld [vmem:[%s148_s0] sm:$0xff]  ;;  %v25_v3 = vld [vmem:[#allocation2 + $0x8] sm:$0xff]  ;;  %s105_s23 = smov [#allocation5]  }
  0x13   :  { %54 = vset.pattern.permute.xlu0 %v104_v0  ;;  %v24_v2 = vld [vmem:[#allocation2] sm:$0xff]  ;;  %s42_s24 = sshll.u32 %s105_s23, 4  ;;  %s43_s24 = int_to_ptr.vmem [resolvable:$true] %s42_s24 }
  0x14   :  { %29 = vperm.xlu0 %54, %v26_v1   ;;  %s77_s1 = scalar_lea.vmem %s43_s24, 256  ;;  %p82_p9 = scmp.lt.s32.totalorder %s43_s24, %s43_s24 }
  0x15   :  { %p78_p8 = scmp.ne.s32.totalorder %s43_s24, %s77_s1  ;;  %p83_p10 = scmp.lt.s32.totalorder %s77_s1, %s77_s1 }
  0x17   :  { %p84_p11 = por %p83_p10, %p82_p9 }
  0x19   :  { %p85_p12 = pnand %p84_p11, %p78_p8 }
  0x93   :  { %v30_v4 = vpop.permute.xlu0 %29 }
  0x94   :  { %v32_v5 = vadd.f32 %v30_v4, %v24_v2  ;;  %v33_v6 = vadd.f32 %v30_v4, %v25_v3 }
  0x96   :  { %34 = vst [vmem:[#allocation5] sm:$0xff] %v32_v5  ;;  %35 = vst [vmem:[#allocation5 + $0x8] sm:$0xff] %v33_v6 }
  0x97   :  { %88 = shalt.err (!%p85_p12)
}
  0x98   :  { %s89_s26 = scalar_lea.hbm %s150_s2, 256 }
  0x99   :  { %p90_p13 = scmp.ne.s32.totalorder %s150_s2, %s89_s26  ;;  %p93_p0 = scmp.lt.u32.totalorder %s89_s26, %s150_s2 }
  0x9b   :  { %p95_p1 = pnand %p93_p0, %p90_p13 }
  0x9d   :  { %98 = shalt.err (!%p95_p1)
}
  0x9e   :  { %45 = dma.vmem_to_hbm [thread:$0]  %s43_s24, 256, %s150_s2, [#allocation4]  }
  0x9f   :  { %101 = dma.done.wait [#allocation4], 256  }
  0xa0   :  { %102 = vsyncadd [#allocation4], 4294967040 }
  0xa1   :  { %49 = vsyncpa [#allocation3], 1 }
  0xa2   :  { %50 = vsyncpa [#allocation4], 1 }

</bundles_post_ra>
